<compile_context>
chip_gen: v6e
topology: v6e:2x2x1
jax: 0.10.0
libtpu: 0.0.40
codegen_flags: <defaults>
</compile_context>

<pallas_src>
import jax
import jax.numpy as jnp
from jax.experimental import pallas as pl
from jax.experimental.pallas import tpu as pltpu

IN_FEATURES = 28 * 28   # 784
OUT_FEATURES = 10
DEFAULT_TB = 4096       # max batch-tile rows; f32 tile ~12.25 MiB, double-buffered


def _round_up(n, m):
    return ((n + m - 1) // m) * m


def netlin_kernel(x_ref, wt_ref, b_ref, o_ref):
    # x_ref : (TB, 784) VMEM f32  (batch tile, software-pipelined over the grid)
    # wt_ref: (784, 10) VMEM f32  (W^T, resident across grid steps)
    # b_ref : (1, 10)   VMEM f32  (resident across grid steps)
    # o_ref : (TB, 10)  VMEM f32
    logits = jnp.dot(x_ref[...], wt_ref[...],
                     preferred_element_type=jnp.float32) + b_ref[...]

    # Numerically-stable log_softmax along the class axis (row-local, so junk
    # rows in a ragged boundary block cannot contaminate valid rows).
    m = jnp.max(logits, axis=-1, keepdims=True)
    shifted = logits - m
    lse = jnp.log(jnp.sum(jnp.exp(shifted), axis=-1, keepdims=True))
    o_ref[...] = (shifted - lse).astype(o_ref.dtype)


def prepare_params(weight, bias):
    """Hoisted out of the forward path: do this once at parameter-init time."""
    wt = jnp.asarray(weight, jnp.float32).T                    # (784, 10)
    b2 = jnp.asarray(bias, jnp.float32).reshape(1, OUT_FEATURES)
    return wt, b2


def netlin_forward(x, wt, b2, tb=DEFAULT_TB):
    """x: (B, 1, 28, 28) f32 NCHW.  wt: (784, 10) f32.  b2: (1, 10) f32."""
    B = x.shape[0]
    # Metadata-only flatten (contiguous reshape); activations stream as f32.
    x_flat = x.reshape(B, -1)

    # Batch tile: multiple of 8 (f32 sublane pack), capped at `tb`, and chosen
    # so the grid has >=2 steps whenever B allows it (v7x has 2 TensorCores).
    TB = min(tb, _round_up(pl.cdiv(B, 2), 8))
    if TB >= B:
        TB = B          # single block covering the whole array (always legal)
    grid = (pl.cdiv(B, TB),)

    return pl.pallas_call(
        netlin_kernel,
        out_shape=jax.ShapeDtypeStruct((B, OUT_FEATURES), jnp.float32),
        grid=grid,
        in_specs=[
            pl.BlockSpec((TB, IN_FEATURES), lambda i: (i, 0)),
            pl.BlockSpec((IN_FEATURES, OUT_FEATURES), lambda i: (0, 0)),
            pl.BlockSpec((1, OUT_FEATURES), lambda i: (0, 0)),
        ],
        out_specs=pl.BlockSpec((TB, OUT_FEATURES), lambda i: (i, 0)),
        compiler_params=pltpu.CompilerParams(
            dimension_semantics=("parallel",),
            vmem_limit_bytes=48 * 1024 * 1024),
    )(x_flat, wt, b2)


def reference_forward(x, weight, bias):
    """Plain-JAX f32 reference mirroring the PyTorch module."""
    B = x.shape[0]
    x_flat = x.reshape(B, -1)
    logits = x_flat @ weight.T + bias
    return jax.nn.log_softmax(logits, axis=1)


if __name__ == "__main__":
    key = jax.random.PRNGKey(0)
    kx, kw, kb, kx2 = jax.random.split(key, 4)

    # nn.Linear-style uniform(-1/sqrt(fan_in), +1/sqrt(fan_in)) init.
    bound = 1.0 / (IN_FEATURES ** 0.5)
    weight = jax.random.uniform(
        kw, (OUT_FEATURES, IN_FEATURES), minval=-bound, maxval=bound,
        dtype=jnp.float32)
    bias = jax.random.uniform(
        kb, (OUT_FEATURES,), minval=-bound, maxval=bound, dtype=jnp.float32)

    # Done once, outside the hot path.
    wt, b2 = prepare_params(weight, bias)

    # --- Test 1: tiny batch (single full-array block) ---
    B1 = 2
    x1 = jax.random.normal(kx, (B1, 1, 28, 28), dtype=jnp.float32)
    out1 = netlin_forward(x1, wt, b2)
    jax.block_until_ready(out1)
    ref1 = reference_forward(x1, weight, bias)
    assert out1.shape == (B1, OUT_FEATURES)
    assert jnp.allclose(out1, ref1, atol=2e-2, rtol=2e-2)

    # --- Test 2: multi-step grid with a ragged boundary block (no padding) ---
    B2 = 2050
    x2 = jax.random.normal(kx2, (B2, 1, 28, 28), dtype=jnp.float32)
    out2 = netlin_forward(x2, wt, b2)
    jax.block_until_ready(out2)
    ref2 = reference_forward(x2, weight, bias)
    assert out2.shape == (B2, OUT_FEATURES)
    assert jnp.allclose(out2, ref2, atol=2e-2, rtol=2e-2)

    print("KERNEL_OK")
</pallas_src>

<mosaic_0001>
module attributes {stable_mosaic.version = 11 : i64} {
  func.func @netlin_kernel(%arg0: i32, %arg1: memref<2x784xf32, #tpu.memory_space<vmem>>, %arg2: memref<784x10xf32, #tpu.memory_space<vmem>>, %arg3: memref<1x10xf32, #tpu.memory_space<vmem>>, %arg4: memref<2x10xf32, #tpu.memory_space<vmem>>) attributes {dimension_semantics = [#tpu.dimension_semantics<parallel>], iteration_bounds = array<i64: 1>, scalar_prefetch = 0 : i64, scratch_operands = 0 : i64, tpu.core_type = #tpu.core_type<tc>, window_params = [{transform_indices = @transform_0, window_bounds = array<i64: 2, 784>}, {pipeline_mode = #tpu.pipeline_mode<synchronous>, transform_indices = @transform_1, window_bounds = array<i64: 784, 10>}, {pipeline_mode = #tpu.pipeline_mode<synchronous>, transform_indices = @transform_2, window_bounds = array<i64: 1, 10>}, {transform_indices = @transform_3, window_bounds = array<i64: 2, 10>}]} {
    %c0 = arith.constant 0 : index
    %c0_0 = arith.constant 0 : index
    %0 = vector.load %arg1[%c0, %c0_0] : memref<2x784xf32, #tpu.memory_space<vmem>>, vector<2x784xf32>
    %c0_1 = arith.constant 0 : index
    %c0_2 = arith.constant 0 : index
    %1 = vector.load %arg2[%c0_1, %c0_2] : memref<784x10xf32, #tpu.memory_space<vmem>>, vector<784x10xf32>
    %cst = arith.constant dense<0.000000e+00> : vector<2x10xf32>
    %2 = tpu.matmul %0, %1, %cst {dimension_numbers = #tpu.dot_dimension_numbers<[1], [0], [0], [1], [0, 0, 1, 1], [], []>} : vector<2x784xf32>, vector<784x10xf32>, vector<2x10xf32> -> vector<2x10xf32>
    %c0_3 = arith.constant 0 : index
    %c0_4 = arith.constant 0 : index
    %3 = vector.load %arg3[%c0_3, %c0_4] : memref<1x10xf32, #tpu.memory_space<vmem>>, vector<1x10xf32>
    %4 = vector.broadcast %3 : vector<1x10xf32> to vector<2x10xf32>
    %5 = arith.addf %2, %4 : vector<2x10xf32>
    %cst_5 = arith.constant dense<0xFF800000> : vector<2xf32>
    %6 = vector.multi_reduction <maximumf>, %5, %cst_5 [1] : vector<2x10xf32> to vector<2xf32>
    %7 = vector.shape_cast %6 : vector<2xf32> to vector<2x1xf32>
    %8 = vector.broadcast %7 : vector<2x1xf32> to vector<2x10xf32>
    %9 = arith.subf %5, %8 : vector<2x10xf32>
    %10 = math.exp %9 : vector<2x10xf32>
    %cst_6 = arith.constant dense<0.000000e+00> : vector<2xf32>
    %11 = vector.multi_reduction <add>, %10, %cst_6 [1] : vector<2x10xf32> to vector<2xf32>
    %12 = vector.shape_cast %11 : vector<2xf32> to vector<2x1xf32>
    %13 = math.log %12 : vector<2x1xf32>
    %14 = vector.broadcast %13 : vector<2x1xf32> to vector<2x10xf32>
    %15 = arith.subf %9, %14 : vector<2x10xf32>
    %c0_7 = arith.constant 0 : index
    %c0_8 = arith.constant 0 : index
    %16 = vector.load %arg4[%c0_7, %c0_8] : memref<2x10xf32, #tpu.memory_space<vmem>>, vector<2x10xf32>
    tpu.vector_store %arg4[%c0_7, %c0_8], %15 {strides = array<i32>} : memref<2x10xf32, #tpu.memory_space<vmem>>, vector<2x10xf32>,
    return
  }
  func.func @transform_0(%arg0: i32) -> (i32, i32) {
    %c0_i32 = arith.constant 0 : i32
    %c0_i32_0 = arith.constant 0 : i32
    return %arg0, %c0_i32 : i32, i32
  }
  func.func @transform_1(%arg0: i32) -> (i32, i32) {
    %c0_i32 = arith.constant 0 : i32
    %c0_i32_0 = arith.constant 0 : i32
    %c0_i32_1 = arith.constant 0 : i32
    return %c0_i32, %c0_i32_0 : i32, i32
  }
  func.func @transform_2(%arg0: i32) -> (i32, i32) {
    %c0_i32 = arith.constant 0 : i32
    %c0_i32_0 = arith.constant 0 : i32
    %c0_i32_1 = arith.constant 0 : i32
    return %c0_i32, %c0_i32_0 : i32, i32
  }
  func.func @transform_3(%arg0: i32) -> (i32, i32) {
    %c0_i32 = arith.constant 0 : i32
    %c0_i32_0 = arith.constant 0 : i32
    return %arg0, %c0_i32 : i32, i32
  }
}

</mosaic_0001>

<bundles_post_ra>
// kernel: tpu_custom_call.1
= control target key start
LH: loop header
LB: loop body
LE: loop exit
PB: predicated region body
PF: predicated region fallthrough
CT: control target
= control target key end

     0   :  { %v623_v27 = vmov 1983009808   ;;  %v128_v29 = vlaneseq  ;;  %s967_s0 = inlined_call_operand.vmem [shape: f32[2,784], index: 0, kind: input, shape index: {}]   ;;  %s968_s1 = inlined_call_operand.vmem [shape: f32[784,10], index: 1, kind: input, shape index: {}]   ;;  %s969_s2 = inlined_call_operand.vmem [shape: f32[1,10], index: 2, kind: input, shape index: {}]   ;;  %s970_s3 = inlined_call_operand.hbm [shape: f32[2,10], index: 3, kind: output, shape index: {}]  }
   0x1   :  { %v48_v0 = vld [vmem:[%s968_s1 + $0xf8] sm:$0xff]  ;;  %v47_v2 = vld [vmem:[%s968_s1 + $0xf0] sm:$0xff]  ;;  %v46_v6 = vld [vmem:[%s968_s1 + $0xe8] sm:$0xff]  ;;  %v126_v28 = vunpack.c.l.s4 %v623_v27 }
   0x2   :  { %v32_v1 = vld [vmem:[%s968_s1 + $0x78] sm:$0xff]  ;;  %476 = vmatprep.subr.mxu0 %v48_v0  ;;  %v31_v4 = vld [vmem:[%s968_s1 + $0x70] sm:$0xff]  ;;  %v30_v8 = vld [vmem:[%s968_s1 + $0x68] sm:$0xff]  ;;  %v129_v39 = vshrl.u32 %v128_v29, 7 }
   0x3   :  { %v80_v3 = vld [vmem:[%s968_s1 + $0x1f8] sm:$0xff]  ;;  %477 = vmatpush3.msra.mxu0 %v32_v1  ;;  %v79_v7 = vld [vmem:[%s968_s1 + $0x1f0] sm:$0xff]  ;;  %v78_v10 = vld [vmem:[%s968_s1 + $0x1e8] sm:$0xff]  ;;  %v127_v38 = vunpack.c.0.s8 %v126_v28 }
   0x4   :  { %v64_v5 = vld [vmem:[%s968_s1 + $0x178] sm:$0xff]  ;;  %511 = vmatprep.subr.mxu1 %v80_v3  ;;  %478 = vmatprep.subr.mxu0 %v47_v2  ;;  %v63_v9 = vld [vmem:[%s968_s1 + $0x170] sm:$0xff]  ;;  %v45_v11 = vld [vmem:[%s968_s1 + $0xe0] sm:$0xff] }
   0x5   :  { %512 = vmatpush3.msra.mxu1 %v64_v5  ;;  %479 = vmatpush3.msra.mxu0 %v31_v4  ;;  %v62_v12 = vld [vmem:[%s968_s1 + $0x168] sm:$0xff]  ;;  %v29_v13 = vld [vmem:[%s968_s1 + $0x60] sm:$0xff]  ;;  %v44_v15 = vld [vmem:[%s968_s1 + $0xd8] sm:$0xff]  ;;  %v776_v48 = vsub.s32 %v127_v38, %v129_v39 }
   0x6   :  { %513 = vmatprep.subr.mxu1 %v79_v7  ;;  %480 = vmatprep.subr.mxu0 %v46_v6  ;;  %v77_v14 = vld [vmem:[%s968_s1 + $0x1e0] sm:$0xff]  ;;  %v28_v17 = vld [vmem:[%s968_s1 + $0x58] sm:$0xff]  ;;  %v43_v19 = vld [vmem:[%s968_s1 + $0xd0] sm:$0xff] }
   0x7   :  { %514 = vmatpush3.msra.mxu1 %v63_v9  ;;  %481 = vmatpush3.msra.mxu0 %v30_v8  ;;  %v61_v16 = vld [vmem:[%s968_s1 + $0x160] sm:$0xff]  ;;  %v76_v18 = vld [vmem:[%s968_s1 + $0x1d8] sm:$0xff]  ;;  %v27_v21 = vld [vmem:[%s968_s1 + $0x50] sm:$0xff] }
   0x8   :  { %515 = vmatprep.subr.mxu1 %v78_v10  ;;  %482 = vmatprep.subr.mxu0 %v45_v11  ;;  %v60_v20 = vld [vmem:[%s968_s1 + $0x158] sm:$0xff]  ;;  %v75_v22 = vld [vmem:[%s968_s1 + $0x1d0] sm:$0xff]  ;;  %v42_v23 = vld [vmem:[%s968_s1 + $0xc8] sm:$0xff] }
   0x9   :  { %516 = vmatpush3.msra.mxu1 %v62_v12  ;;  %483 = vmatpush3.msra.mxu0 %v29_v13  ;;  %v59_v24 = vld [vmem:[%s968_s1 + $0x150] sm:$0xff]  ;;  %v26_v25 = vld [vmem:[%s968_s1 + $0x48] sm:$0xff]  ;;  %v41_v30 = vld [vmem:[%s968_s1 + $0xc0] sm:$0xff] }
   0xa   :  { %517 = vmatprep.subr.mxu1 %v77_v14  ;;  %484 = vmatprep.subr.mxu0 %v44_v15  ;;  %v74_v26 = vld [vmem:[%s968_s1 + $0x1c8] sm:$0xff]  ;;  %v25_v32 = vld [vmem:[%s968_s1 + $0x40] sm:$0xff]  ;;  %v40_v34 = vld [vmem:[%s968_s1 + $0xb8] sm:$0xff] }
   0xb   :  { %518 = vmatpush3.msra.mxu1 %v61_v16  ;;  %485 = vmatpush3.msra.mxu0 %v28_v17  ;;  %v58_v31 = vld [vmem:[%s968_s1 + $0x148] sm:$0xff]  ;;  %v73_v33 = vld [vmem:[%s968_s1 + $0x1c0] sm:$0xff]  ;;  %v24_v36 = vld [vmem:[%s968_s1 + $0x38] sm:$0xff] }
   0xc   :  { %519 = vmatprep.subr.mxu1 %v76_v18  ;;  %486 = vmatprep.subr.mxu0 %v43_v19  ;;  %v57_v35 = vld [vmem:[%s968_s1 + $0x140] sm:$0xff]  ;;  %v72_v37 = vld [vmem:[%s968_s1 + $0x1b8] sm:$0xff]  ;;  %v39_v40 = vld [vmem:[%s968_s1 + $0xb0] sm:$0xff] }
   0xd   :  { %520 = vmatpush3.msra.mxu1 %v60_v20  ;;  %487 = vmatpush3.msra.mxu0 %v27_v21  ;;  %v56_v41 = vld [vmem:[%s968_s1 + $0x138] sm:$0xff]  ;;  %v23_v42 = vld [vmem:[%s968_s1 + $0x30] sm:$0xff]  ;;  %v38_v44 = vld [vmem:[%s968_s1 + $0xa8] sm:$0xff] }
   0xe   :  { %521 = vmatprep.subr.mxu1 %v75_v22  ;;  %488 = vmatprep.subr.mxu0 %v42_v23  ;;  %v71_v43 = vld [vmem:[%s968_s1 + $0x1b0] sm:$0xff]  ;;  %v22_v46 = vld [vmem:[%s968_s1 + $0x28] sm:$0xff]  ;;  %v37_v49 = vld [vmem:[%s968_s1 + $0xa0] sm:$0xff] }
   0xf   :  { %522 = vmatpush3.msra.mxu1 %v59_v24  ;;  %489 = vmatpush3.msra.mxu0 %v26_v25  ;;  %v55_v45 = vld [vmem:[%s968_s1 + $0x130] sm:$0xff]  ;;  %v70_v47 = vld [vmem:[%s968_s1 + $0x1a8] sm:$0xff]  ;;  %v15_v51 = vld [vmem:[%s967_s0] sm:$0xff] }
  0x10   :  { %523 = vmatprep.subr.mxu1 %v74_v26  ;;  %490 = vmatprep.subr.mxu0 %v41_v30  ;;  %v54_v50 = vld [vmem:[%s968_s1 + $0x128] sm:$0xff]  ;;  %v21_v52 = vld [vmem:[%s968_s1 + $0x20] sm:$0xff]  ;;  %v36_v54 = vld [vmem:[%s968_s1 + $0x98] sm:$0xff]  ;;  %v131_v58 = vrot.slane %v15_v51, %v776_v48  ;;  %v124_v59 = vcombine.high %v15_v51, %v15_v51 }
  0x11   :  { %524 = vmatpush3.msra.mxu1 %v58_v31  ;;  %491 = vmatpush3.msra.mxu0 %v25_v32  ;;  %v69_v53 = vld [vmem:[%s968_s1 + $0x1a0] sm:$0xff]  ;;  %v20_v56 = vld [vmem:[%s968_s1 + $0x18] sm:$0xff]  ;;  %v35_v60 = vld [vmem:[%s968_s1 + $0x90] sm:$0xff] }
  0x12   :  { %525 = vmatprep.subr.mxu1 %v73_v33  ;;  %492 = vmatprep.subr.mxu0 %v40_v34  ;;  %v53_v55 = vld [vmem:[%s968_s1 + $0x120] sm:$0xff]  ;;  %v68_v57 = vld [vmem:[%s968_s1 + $0x198] sm:$0xff]  ;;  %v19_v62 = vld [vmem:[%s968_s1 + $0x10] sm:$0xff]  ;;  %v139_v4 = vcombine.high %v131_v58, %v131_v58  ;;  %v138_v5 = vrot.slane %v124_v59, %v776_v48 }
  0x13   :  { %526 = vmatpush3.msra.mxu1 %v57_v35  ;;  %493 = vmatpush3.msra.mxu0 %v24_v36  ;;  %v52_v61 = vld [vmem:[%s968_s1 + $0x118] sm:$0xff]  ;;  %v67_v63 = vld [vmem:[%s968_s1 + $0x190] sm:$0xff]  ;;  %v34_v0 = vld [vmem:[%s968_s1 + $0x88] sm:$0xff] }
  0x14   :  { %527 = vmatprep.subr.mxu1 %v72_v37  ;;  %494 = vmatprep.subr.mxu0 %v39_v40  ;;  %v51_v1 = vld [vmem:[%s968_s1 + $0x110] sm:$0xff]  ;;  %v18_v2 = vld [vmem:[%s968_s1 + $0x8] sm:$0xff]  ;;  %v33_v6 = vld [vmem:[%s968_s1 + $0x80] sm:$0xff]  ;;  %v140_v12 = vcombine.high %v138_v5, %v138_v5 }
  0x15   :  { %528 = vmatpush3.msra.mxu1 %v56_v41  ;;  %495 = vmatpush3.msra.mxu0 %v23_v42  ;;  %v66_v3 = vld [vmem:[%s968_s1 + $0x188] sm:$0xff]  ;;  %v17_v7 = vld [vmem:[%s968_s1] sm:$0xff]  ;;  %v112_v10 = vld [vmem:[%s968_s1 + $0x2f8] sm:$0xff] }
  0x16   :  { %529 = vmatprep.subr.mxu1 %v71_v43  ;;  %496 = vmatprep.subr.mxu0 %v38_v44  ;;  %v50_v8 = vld [vmem:[%s968_s1 + $0x108] sm:$0xff]  ;;  %v65_v9 = vld [vmem:[%s968_s1 + $0x180] sm:$0xff]  ;;  %v96_v13 = vld [vmem:[%s968_s1 + $0x278] sm:$0xff] }
  0x17   :  { %530 = vmatpush3.msra.mxu1 %v55_v45  ;;  %497 = vmatpush3.msra.mxu0 %v22_v46  ;;  %v49_v11 = vld [vmem:[%s968_s1 + $0x100] sm:$0xff]  ;;  %v16_v14 = vld [vmem:[%s967_s0 + $0x8] sm:$0x3f]  ;;  %v111_v15 = vld [vmem:[%s968_s1 + $0x2f0] sm:$0xff] }
  0x18   :  { %531 = vmatprep.subr.mxu1 %v70_v47  ;;  %498 = vmatprep.subr.mxu0 %v37_v49  ;;  %v859_v16 = vrot.slane %v16_v14, %v776_v48 }
  0x19   :  { %532 = vmatpush3.msra.mxu1 %v54_v50  ;;  %499 = vmatpush3.msra.mxu0 %v21_v52 }
  0x1a   :  { %533 = vmatprep.subr.mxu1 %v69_v53  ;;  %500 = vmatprep.subr.mxu0 %v36_v54 }
  0x1b   :  { %534 = vmatpush3.msra.mxu1 %v53_v55  ;;  %501 = vmatpush3.msra.mxu0 %v20_v56 }
  0x1c   :  { %535 = vmatprep.subr.mxu1 %v68_v57  ;;  %502 = vmatprep.subr.mxu0 %v35_v60 }
  0x1d   :  { %536 = vmatpush3.msra.mxu1 %v52_v61  ;;  %503 = vmatpush3.msra.mxu0 %v19_v62 }
  0x1e   :  { %537 = vmatprep.subr.mxu1 %v67_v63  ;;  %504 = vmatprep.subr.mxu0 %v34_v0 }
  0x1f   :  { %538 = vmatpush3.msra.mxu1 %v51_v1  ;;  %505 = vmatpush3.msra.mxu0 %v18_v2 }
  0x20   :  { %539 = vmatprep.subr.mxu1 %v66_v3  ;;  %506 = vmatprep.subr.mxu0 %v33_v6 }
  0x21   :  { %230 = vmatprep.mubr.f32.mxu0 %v139_v4  ;;  %507 = vmatpush3.msra.mxu0 %v17_v7 }
  0x22   :  { %540 = vmatpush3.msra.mxu1 %v50_v8  ;;  %231 = vmatmul.mubr.f32.vlgmr.msra.gmra.mxu0 %v131_v58 }
  0x23   :  { %541 = vmatprep.subr.mxu1 %v65_v9 }
  0x24   :  { %8 = vsyncpa [#allocation3], 0  ;;  %546 = vmatprep.subr.mxu0 %v112_v10  ;;  %542 = vmatpush3.msra.mxu1 %v49_v11  ;;  %v95_v17 = vld [vmem:[%s968_s1 + $0x270] sm:$0xff]  ;;  %v110_v18 = vld [vmem:[%s968_s1 + $0x2e8] sm:$0xff]  ;;  %v141_v19 = vcombine.high %v16_v14, %v16_v14  ;;  %v156_v20 = vcombine.high %v859_v16, %v859_v16  ;;  %v624_v25 = vmov 0.0   ;;  %vm163_vm0 = vcmask 130048  }
  0x25   :  { %300 = vmatprep.mubr.f32.mxu1 %v140_v12  ;;  %547 = vmatpush3.msra.mxu0 %v96_v13  ;;  %v94_v21 = vld [vmem:[%s968_s1 + $0x268] sm:$0xff]  ;;  %v109_v23 = vld [vmem:[%s968_s1 + $0x2e0] sm:$0xff]  ;;  %v108_v27 = vld [vmem:[%s968_s1 + $0x2d8] sm:$0xff]  ;;  %vm625_vm1 = vmmov 0   ;;  %vm446_vm2 = vcmask 74752  }
  0x26   :  { %301 = vmatmul.mubr.f32.vlgmr.msra.gmra.mxu1 %v138_v5  ;;  %548 = vmatprep.subr.mxu0 %v111_v15  ;;  %v114_v22 = vld [vmem:[%s968_s1 + $0x308] sm:$0xff]  ;;  %v93_v24 = vld [vmem:[%s968_s1 + $0x260] sm:$0xff]  ;;  %v155_v28 = vrot.slane %v141_v19, %v776_v48  ;;  %v92_v29 = vld [vmem:[%s968_s1 + $0x258] sm:$0xff] }
  0x27   :  { %549 = vmatpush3.msra.mxu0 %v95_v17  ;;  %370 = vmatprep.mubr.f32.mxu0 %v156_v20  ;;  %v113_v26 = vld [vmem:[%s968_s1 + $0x300] sm:$0xff]  ;;  %v107_v30 = vld [vmem:[%s968_s1 + $0x2d0] sm:$0xff]  ;;  %v106_v32 = vld [vmem:[%s968_s1 + $0x2c8] sm:$0xff] }
  0x28   :  { %550 = vmatprep.subr.mxu0 %v110_v18  ;;  %584 = vmatprep.subr.mxu1 %v624_v25  ;;  %v91_v31 = vld [vmem:[%s968_s1 + $0x250] sm:$0xff]  ;;  %v90_v33 = vld [vmem:[%s968_s1 + $0x248] sm:$0xff]  ;;  %v105_v34 = vld [vmem:[%s968_s1 + $0x2c0] sm:$0xff] }
  0x29   :  { %551 = vmatpush3.msra.mxu0 %v94_v21  ;;  %585 = vmatpush3.msra.mxu1 %v114_v22  ;;  %v89_v35 = vld [vmem:[%s968_s1 + $0x240] sm:$0xff]  ;;  %v104_v36 = vld [vmem:[%s968_s1 + $0x2b8] sm:$0xff]  ;;  %v103_v38 = vld [vmem:[%s968_s1 + $0x2b0] sm:$0xff] }
  0x2a   :  { %552 = vmatprep.subr.mxu0 %v109_v23  ;;  %586 = vmatprep.subr.mxu1 %v624_v25  ;;  %v88_v37 = vld [vmem:[%s968_s1 + $0x238] sm:$0xff]  ;;  %v87_v39 = vld [vmem:[%s968_s1 + $0x230] sm:$0xff]  ;;  %v102_v40 = vld [vmem:[%s968_s1 + $0x2a8] sm:$0xff] }
  0x2b   :  { %553 = vmatpush3.msra.mxu0 %v93_v24  ;;  %587 = vmatpush3.msra.mxu1 %v113_v26  ;;  %v86_v41 = vld [vmem:[%s968_s1 + $0x228] sm:$0xff]  ;;  %v101_v42 = vld [vmem:[%s968_s1 + $0x2a0] sm:$0xff]  ;;  %v100_v44 = vld [vmem:[%s968_s1 + $0x298] sm:$0xff] }
  0x2c   :  { %554 = vmatprep.subr.mxu0 %v108_v27  ;;  %588 = vmatprep.mubr.msk.f32.mxu1 %vm625_vm1, %v624_v25  ;;  %v85_v43 = vld [vmem:[%s968_s1 + $0x220] sm:$0xff]  ;;  %v84_v45 = vld [vmem:[%s968_s1 + $0x218] sm:$0xff]  ;;  %v99_v46 = vld [vmem:[%s968_s1 + $0x290] sm:$0xff] }
  0x2d   :  { %555 = vmatpush3.msra.mxu0 %v92_v29  ;;  %589 = vmatmul.mubr.msk.f32.vlgmr.msra.gmra.mxu1 %vm163_vm0, %v155_v28  ;;  %v83_v47 = vld [vmem:[%s968_s1 + $0x210] sm:$0xff]  ;;  %v98_v48 = vld [vmem:[%s968_s1 + $0x288] sm:$0xff]  ;;  %v97_v50 = vld [vmem:[%s968_s1 + $0x280] sm:$0xff] }
  0x2e   :  { %556 = vmatprep.subr.mxu0 %v107_v30  ;;  %v82_v49 = vld [vmem:[%s968_s1 + $0x208] sm:$0xff]  ;;  %v81_v51 = vld [vmem:[%s968_s1 + $0x200] sm:$0xff]  ;;  %s626_s1 = smov [#allocation2]  }
  0x2f   :  { %557 = vmatpush3.msra.mxu0 %v91_v31  ;;  %v474_v59 = vld [vmem:[%s969_s2] ss:$0 sm:$0xff]  ;;  %s466_s2 = sshll.u32 %s626_s1, 4  ;;  %s467_s2 = int_to_ptr.vmem [resolvable:$true] %s466_s2 }
  0x30   :  { %558 = vmatprep.subr.mxu0 %v106_v32  ;;  %s601_s22 = scalar_lea.vmem %s467_s2, 32  ;;  %p606_p1 = scmp.lt.s32.totalorder %s467_s2, %s467_s2 }
  0x31   :  { %559 = vmatpush3.msra.mxu0 %v90_v33  ;;  %p602_p0 = scmp.ne.s32.totalorder %s467_s2, %s601_s22  ;;  %p607_p2 = scmp.lt.s32.totalorder %s601_s22, %s601_s22 }
  0x32   :  { %560 = vmatprep.subr.mxu0 %v105_v34 }
  0x33   :  { %561 = vmatpush3.msra.mxu0 %v89_v35  ;;  %p608_p3 = por %p607_p2, %p606_p1 }
  0x34   :  { %562 = vmatprep.subr.mxu0 %v104_v36 }
  0x35   :  { %563 = vmatpush3.msra.mxu0 %v88_v37  ;;  %p609_p4 = pnand %p608_p3, %p602_p0 }
  0x36   :  { %564 = vmatprep.subr.mxu0 %v103_v38 }
  0x37   :  { %565 = vmatpush3.msra.mxu0 %v87_v39 }
  0x38   :  { %566 = vmatprep.subr.mxu0 %v102_v40 }
  0x39   :  { %567 = vmatpush3.msra.mxu0 %v86_v41 }
  0x3a   :  { %568 = vmatprep.subr.mxu0 %v101_v42 }
  0x3b   :  { %569 = vmatpush3.msra.mxu0 %v85_v43 }
  0x3c   :  { %570 = vmatprep.subr.mxu0 %v100_v44 }
  0x3d   :  { %571 = vmatpush3.msra.mxu0 %v84_v45 }
  0x3e   :  { %572 = vmatprep.subr.mxu0 %v99_v46 }
  0x3f   :  { %573 = vmatpush3.msra.mxu0 %v83_v47 }
  0x40   :  { %574 = vmatprep.subr.mxu0 %v98_v48 }
  0x41   :  { %575 = vmatpush3.msra.mxu0 %v82_v49 }
  0x42   :  { %576 = vmatprep.subr.mxu0 %v97_v50 }
  0x43   :  { %577 = vmatpush3.msra.mxu0 %v81_v51 }
  0x44   :  { %371 = vmatmul.mubr.f32.vlgmr.msra.gmra.mxu0 %v859_v16 }
  0xe2   :  { %v508_v56 = vpop.f32.mrf.mxu0 }
  0xe4   :  { %v509_v57 = vpop.f32.mrf.mxu0 }
  0xe5   :  { %v510_v58 = vadd.f32 %v509_v57, %v508_v56 }
  0xe6   :  { %v543_v52 = vpop.f32.mrf.mxu1 }
  0xe7   :  { %v233_v60 = vadd.f32 %v510_v58, %v474_v59 }
  0xe8   :  { %v544_v53 = vpop.f32.mrf.mxu1 }
  0xe9   :  { %v545_v61 = vadd.f32 %v544_v53, %v543_v52 }
  0xeb   :  { %v303_v0 = vadd.f32 %v545_v61, %v233_v60 }
  0xed   :  { %v442_v54 = vpop.f32.mrf.mxu1 }
  0xef   :  { %v590_v55 = vpop.f32.mrf.mxu1 }
 0x104   :  { %v578_v62 = vpop.f32.mrf.mxu0 }
 0x106   :  { %v579_v63 = vpop.f32.mrf.mxu0 }
 0x107   :  { %v580_v1 = vadd.f32 %v579_v63, %v578_v62 }
 0x109   :  { %v373_v2 = vadd.f32 %v580_v1, %v303_v0 }
 0x10b   :  { %v443_v3 = vadd.f32 %v442_v54, %v373_v2 }
 0x10d   :  { %v447_v4 = vsel %vm446_vm2, %v443_v3, -inf }
 0x10e   :  { %448 = vmax.xlane.f32.xlu0 %v447_v4 }
 0x197   :  { %v449_v5 = vpop.xlane.xlu0 %448 }
 0x198   :  { %v450_v6 = vsub.f32 %v443_v3, %v449_v5 }
 0x19a   :  { %v451_v7 = vmul.f32 1.442695, %v450_v6 }
 0x19c   :  { %597 = vpow2.f32 %v451_v7 }
 0x1a9   :  { %v598_v8 = vpop.eup %597 }
 0x1aa   :  { %v453_v9 = vsel %vm446_vm2, %v598_v8, 0.0 }
 0x1ab   :  { %454 = vadd.xlane.f32.xlu0 %v453_v9 }
 0x234   :  { %v455_v10 = vpop.xlane.xlu0 %454 }
 0x235   :  { %599 = vlog2.f32 %v455_v10 }
 0x242   :  { %v600_v11 = vpop.eup %599 }
 0x243   :  { %v457_v12 = vmul.f32 0.6931472, %v600_v11 }
 0x245   :  { %v458_v13 = vsub.f32 %v450_v6, %v457_v12 }
 0x247   :  { %459 = vst.msk [vmem:[#allocation2] sm:$0x3] %vm446_vm2, %v458_v13 }
 0x248   :  { %612 = shalt.err (!%p609_p4)
}
 0x249   :  { %469 = dma.vmem_to_hbm [thread:$0]  %s467_s2, 32, %s970_s3, [#allocation3]  }
 0x24a   :  { %621 = dma.done.wait [#allocation3], 32  }
 0x24b   :  { %622 = vsyncadd [#allocation3], 4294967264 }
 0x24c   :  { %473 = vsyncpa [#allocation3], 1 }

</bundles_post_ra>
